<compile_context>
chip_gen: v6e
topology: v6e:2x2x1
jax: 0.10.0
libtpu: 0.0.40
codegen_flags: <defaults>
</compile_context>

<pallas_src>
import jax
import jax.numpy as jnp
from jax.experimental import pallas as pl
from jax.experimental.pallas import tpu as pltpu

KSIZE = 7
PAD = (KSIZE - 1) // 2


def sam_kernel(t_ref, x_ref, o_ref):
    # t_ref: VMEM (2*HWp, HWp) f32 -- full zero-padded 7x7 conv as a Toeplitz
    #        matrix, rows ordered [avg-channel taps | max-channel taps].
    # x_ref: VMEM (Bt, C, HWp) input batch tile (lane-dense last dim).
    # o_ref: VMEM (Bt, C, HWp).
    # Channel reductions with f32 accumulation; stay lane-dense: (Bt, HWp).
    avg = jnp.mean(x_ref[...].astype(jnp.float32), axis=1)
    mx = jnp.max(x_ref[...], axis=1).astype(jnp.float32)

    # Entire 7x7 conv (incl. zero padding) as one MXU matmul.
    lhs = jnp.concatenate([avg, mx], axis=-1)                    # (Bt, 2*HWp)
    logits = jnp.dot(lhs, t_ref[...], preferred_element_type=jnp.float32)
    attn = jax.nn.sigmoid(logits)                                # (Bt, HWp)

    # Re-read x for the apply: no f32 copy of the block stays live across the
    # conv, and the multiply runs in the input dtype.
    x = x_ref[...]
    o_ref[...] = (x * attn[:, None, :].astype(x.dtype)).astype(o_ref.dtype)


def _full_toeplitz(weight, h, w, hw_pad):
    """Conv2d(2,1,7,padding=3,bias=False) weight (1,2,7,7) -> T of shape
    (2*hw_pad, hw_pad) such that
      conv(cat([avg,max],1))[b,0].ravel() == cat([avg.ravel(), max.ravel()]) @ T
    (rows/cols beyond h*w are zero)."""
    wk = jnp.asarray(weight, jnp.float32).reshape(2, KSIZE, KSIZE)  # [avg, max]
    ri = jnp.arange(h)[:, None, None, None]     # input row
    ci = jnp.arange(w)[None, :, None, None]     # input col
    ro = jnp.arange(h)[None, None, :, None]     # output row
    co = jnp.arange(w)[None, None, None, :]     # output col
    kh = ri - ro + PAD                          # tap indices (cross-correlation)
    kw = ci - co + PAD
    valid = (kh >= 0) & (kh < KSIZE) & (kw >= 0) & (kw < KSIZE)
    taps = wk[:, jnp.clip(kh, 0, KSIZE - 1), jnp.clip(kw, 0, KSIZE - 1)]  # (2,H,W,H,W)
    taps = jnp.where(valid[None], taps, 0.0)
    t = taps.reshape(2, h * w, h * w)
    if hw_pad != h * w:
        t = jnp.pad(t, ((0, 0), (0, hw_pad - h * w), (0, hw_pad - h * w)))
    return jnp.concatenate([t[0], t[1]], axis=0)                 # (2*hw_pad, hw_pad)


def _pick_block_b(batch, per_batch_bytes, budget_bytes):
    """Largest batch-tile that (a) divides B, (b) fits the per-block budget,
    (c) keeps >= 2 grid steps when B >= 2 (so both v7x TensorCores get work)."""
    best = 1
    for cand in range(1, batch + 1):
        if batch % cand:
            continue
        if cand * per_batch_bytes > budget_bytes:
            continue
        if batch >= 2 and batch // cand < 2:
            continue
        best = cand
    return best


def spatial_attention(x, weight, *, block_b=None, block_budget_bytes=4 << 20):
    """x: (B, C, H, W); weight: (1, 2, 7, 7) from Conv2d(2, 1, 7, padding=3, bias=False)."""
    b, c, h, w = x.shape
    hw = h * w
    hw_pad = ((hw + 127) // 128) * 128           # keep the output lane-dense

    # TODO(synk): for large spatial maps (hw_pad >~ 2048) the full (2*HWp, HWp)
    # Toeplitz gets too big; switch the conv to pltpu.roll lane-shift taps.
    t = _full_toeplitz(weight, h, w, hw_pad)     # (2*hw_pad, hw_pad) f32
    t_bytes = 2 * hw_pad * hw_pad * 4

    x_flat = x.reshape(b, c, hw)                 # metadata-only view
    if hw_pad != hw:
        x_flat = jnp.pad(x_flat, ((0, 0), (0, 0), (0, hw_pad - hw)))

    per_b_bytes = c * hw_pad * x.dtype.itemsize
    if block_b is None:
        block_b = _pick_block_b(b, per_b_bytes, block_budget_bytes)
    assert b % block_b == 0, "block_b must divide batch"

    # In-flight footprint: in+out double-buffered (~4x block) + double-buffered T.
    block_bytes = block_b * per_b_bytes
    need = 4 * block_bytes + 2 * t_bytes + (2 << 20)
    vmem_limit = int(min(max(2 * need, 16 << 20), 64 << 20))

    out = pl.pallas_call(
        sam_kernel,
        out_shape=jax.ShapeDtypeStruct((b, c, hw_pad), x.dtype),
        grid_spec=pltpu.PrefetchScalarGridSpec(
            num_scalar_prefetch=0,
            grid=(b // block_b,),
            in_specs=[
                pl.BlockSpec((2 * hw_pad, hw_pad), lambda i: (0, 0)),    # conv Toeplitz
                pl.BlockSpec((block_b, c, hw_pad), lambda i: (i, 0, 0)),  # x batch tile
            ],
            out_specs=pl.BlockSpec((block_b, c, hw_pad), lambda i: (i, 0, 0)),
        ),
        compiler_params=pltpu.CompilerParams(
            dimension_semantics=("parallel",),   # batch tiles shard across TCs
            vmem_limit_bytes=vmem_limit,
        ),
    )(t, x_flat)

    if hw_pad != hw:
        out = out[..., :hw]
    return out.reshape(b, c, h, w)


if __name__ == "__main__":
    key = jax.random.PRNGKey(0)
    kx, kw = jax.random.split(key)

    B, C, H, W = 2, 4, 16, 16
    x = jax.random.normal(kx, (B, C, H, W), dtype=jnp.float32)

    # deterministic Conv2d(2, 1, 7, bias=False) weight init (kaiming-uniform-like)
    fan_in = 2 * KSIZE * KSIZE
    bound = 1.0 / (fan_in ** 0.5)
    weight = jax.random.uniform(kw, (1, 2, KSIZE, KSIZE),
                                dtype=jnp.float32, minval=-bound, maxval=bound)

    out = spatial_attention(x, weight)
    out = jax.block_until_ready(out)

    # pure-JAX reference for correctness
    avg = jnp.mean(x, axis=1, keepdims=True)
    mx = jnp.max(x, axis=1, keepdims=True)
    cat = jnp.concatenate([avg, mx], axis=1)
    conv = jax.lax.conv_general_dilated(
        cat, weight, window_strides=(1, 1),
        padding=[(PAD, PAD), (PAD, PAD)],
        dimension_numbers=("NCHW", "OIHW", "NCHW"))
    ref = jax.nn.sigmoid(conv) * x

    assert out.shape == (B, C, H, W)
    assert jnp.allclose(out, ref, atol=2e-5, rtol=1e-5), "mismatch vs reference"
    print("KERNEL_OK")
</pallas_src>

<mosaic_0001>
module attributes {stable_mosaic.version = 11 : i64} {
  func.func @sam_kernel(%arg0: i32, %arg1: memref<512x256xf32, #tpu.memory_space<vmem>>, %arg2: memref<1x4x256xf32, #tpu.memory_space<vmem>>, %arg3: memref<1x4x256xf32, #tpu.memory_space<vmem>>) attributes {dimension_semantics = [#tpu.dimension_semantics<parallel>], iteration_bounds = array<i64: 2>, scalar_prefetch = 0 : i64, scratch_operands = 0 : i64, tpu.core_type = #tpu.core_type<tc>, window_params = [{pipeline_mode = #tpu.pipeline_mode<synchronous>, transform_indices = @transform_0, window_bounds = array<i64: 512, 256>}, {transform_indices = @transform_1, window_bounds = array<i64: 1, 4, 256>}, {transform_indices = @transform_2, window_bounds = array<i64: 1, 4, 256>}]} {
    %c0 = arith.constant 0 : index
    %c0_0 = arith.constant 0 : index
    %c0_1 = arith.constant 0 : index
    %0 = vector.load %arg2[%c0, %c0_0, %c0_1] : memref<1x4x256xf32, #tpu.memory_space<vmem>>, vector<1x4x256xf32>
    %cst = arith.constant dense<0.000000e+00> : vector<1x256xf32>
    %1 = vector.multi_reduction <add>, %0, %cst [1] : vector<1x4x256xf32> to vector<1x256xf32>
    %cst_2 = arith.constant 4.000000e+00 : f32
    %2 = vector.broadcast %cst_2 : f32 to vector<1x256xf32>
    %3 = arith.divf %1, %2 : vector<1x256xf32>
    %c0_3 = arith.constant 0 : index
    %c0_4 = arith.constant 0 : index
    %c0_5 = arith.constant 0 : index
    %4 = vector.load %arg2[%c0_3, %c0_4, %c0_5] : memref<1x4x256xf32, #tpu.memory_space<vmem>>, vector<1x4x256xf32>
    %cst_6 = arith.constant dense<0xFF800000> : vector<1x256xf32>
    %5 = vector.multi_reduction <maximumf>, %4, %cst_6 [1] : vector<1x4x256xf32> to vector<1x256xf32>
    %6 = tpu.concatenate %3, %5 in 1 : vector<1x256xf32>, vector<1x256xf32> -> vector<1x512xf32>
    %c0_7 = arith.constant 0 : index
    %c0_8 = arith.constant 0 : index
    %7 = vector.load %arg1[%c0_7, %c0_8] : memref<512x256xf32, #tpu.memory_space<vmem>>, vector<512x256xf32>
    %cst_9 = arith.constant dense<0.000000e+00> : vector<1x256xf32>
    %8 = tpu.matmul %6, %7, %cst_9 {dimension_numbers = #tpu.dot_dimension_numbers<[1], [0], [0], [1], [0, 0, 1, 1], [], []>} : vector<1x512xf32>, vector<512x256xf32>, vector<1x256xf32> -> vector<1x256xf32>
    %9 = arith.negf %8 : vector<1x256xf32>
    %10 = math.exp %9 : vector<1x256xf32>
    %cst_10 = arith.constant 1.000000e+00 : f32
    %11 = vector.broadcast %cst_10 : f32 to vector<1x256xf32>
    %12 = arith.addf %11, %10 : vector<1x256xf32>
    %13 = arith.divf %11, %12 : vector<1x256xf32>
    %c0_11 = arith.constant 0 : index
    %c0_12 = arith.constant 0 : index
    %c0_13 = arith.constant 0 : index
    %14 = vector.load %arg2[%c0_11, %c0_12, %c0_13] : memref<1x4x256xf32, #tpu.memory_space<vmem>>, vector<1x4x256xf32>
    %15 = vector.shape_cast %13 : vector<1x256xf32> to vector<1x1x256xf32>
    %16 = vector.broadcast %15 : vector<1x1x256xf32> to vector<1x4x256xf32>
    %17 = arith.mulf %14, %16 : vector<1x4x256xf32>
    %c0_14 = arith.constant 0 : index
    %c0_15 = arith.constant 0 : index
    %c0_16 = arith.constant 0 : index
    %18 = vector.load %arg3[%c0_14, %c0_15, %c0_16] : memref<1x4x256xf32, #tpu.memory_space<vmem>>, vector<1x4x256xf32>
    tpu.vector_store %arg3[%c0_14, %c0_15, %c0_16], %17 {strides = array<i32>} : memref<1x4x256xf32, #tpu.memory_space<vmem>>, vector<1x4x256xf32>,
    return
  }
  func.func @transform_0(%arg0: i32) -> (i32, i32) {
    %c0_i32 = arith.constant 0 : i32
    %c0_i32_0 = arith.constant 0 : i32
    %c0_i32_1 = arith.constant 0 : i32
    return %c0_i32, %c0_i32_0 : i32, i32
  }
  func.func @transform_1(%arg0: i32) -> (i32, i32, i32) {
    %c0_i32 = arith.constant 0 : i32
    %c0_i32_0 = arith.constant 0 : i32
    %c0_i32_1 = arith.constant 0 : i32
    return %arg0, %c0_i32, %c0_i32_0 : i32, i32, i32
  }
  func.func @transform_2(%arg0: i32) -> (i32, i32, i32) {
    %c0_i32 = arith.constant 0 : i32
    %c0_i32_0 = arith.constant 0 : i32
    %c0_i32_1 = arith.constant 0 : i32
    return %arg0, %c0_i32, %c0_i32_0 : i32, i32, i32
  }
}

</mosaic_0001>

<bundles_post_ra>
// kernel: tpu_custom_call.1
= control target key start
LH: loop header
LB: loop body
LE: loop exit
PB: predicated region body
PF: predicated region fallthrough
CT: control target
= control target key end

     0   :  { %7 = vsyncpa [#allocation3], 0  ;;  %s1008_s0 = inlined_call_operand.hbm [shape: f32[512,256], index: 0, kind: input, shape index: {}]   ;;  %s1009_s1 = inlined_call_operand.hbm [shape: f32[2,4,256], index: 1, kind: input, shape index: {}]   ;;  %s1010_s2 = inlined_call_operand.hbm [shape: f32[2,4,256], index: 2, kind: output, shape index: {}]  }
   0x1   :  { %8 = vsyncpa [#allocation6], 0 }
   0x2   :  { %10 = vsyncpa [#allocation6 + $0x1], 0 }
   0x3   :  { %11 = vsyncpa [#allocation4], 0 }
   0x4   :  { %13 = vsyncpa [#allocation4 + $0x1], 0  ;;  %s836_s9 = smov 0   ;;  %s838_s10 = smov 0  }
   0x5   :  { %s840_s11 = smov 0   ;;  %s842_s12 = smov 0  }
   0x6 LB: > { %s857_s13 = sadd.s32 4294967295, %s814_s12   ;;  %s604_s14 = sadd.s32 4294967294, %s814_s12   ;;  %s814_s12 = sphi %s842_s12, %s1032_s12   ;;  %s810_s11 = sphi %s840_s11, %s1031_s11   ;;  %s806_s10 = sphi %s838_s10, %s1030_s10   ;;  %s802_s9 = sphi %s836_s9, %s1029_s9  }
   0x7   : > { %p60_p0 = scmp.ne.s32.totalorder %s806_s10, %s802_s9  ;;  %p1011_p1 = scmp.eq.s32.totalorder %s857_s13, 0 }
   0x8   : > { %p90_p3 = scmp.eq.s32.totalorder %s604_s14, 1  ;;  %p605_p5 = scmp.ge.s32.totalorder %s814_s12, 1 }
   0x9   : > { %p866_p4 = por %p1011_p1, %p60_p0  ;;  %p97_p7 = scmp.lt.s32.totalorder %s814_s12, 3 }
   0xa   : > { %p871_p6 = por %p90_p3, %p60_p0  ;;  %s816_s18 = smov [#allocation2]  }
   0xb   : > { %s1015_s15 = scalar_select %p866_p4, 1, 0 }
   0xc   : > { %s1016_s16 = scalar_select %p871_p6, 1, 0 }
   0xd   : > { %p876_p8 = pnand %p605_p5, %p97_p7  ;;  %s109_s19 = sshll.u32 %s816_s18, 4  ;;  %s110_s19 = int_to_ptr.vmem [resolvable:$true] %s109_s19 }
   0xe   : > { %s890_s21 = sadd.s32 1, %s814_s12   ;;  %s47_s22 = sadd.s32 1, %s810_s11 }
   0xf   : > { %s1017_s17 = scalar_select %p876_p8, 1, 0 }
  0x10   : > { %p632_p9 = pneg %p876_p8  ;;  %s44_s23 = ssub.s32 %s814_s12, %s890_s21 }
  0x11   : > { %s703_s24 = scalar_lea.vmem %s110_s19, 16384  ;;  %p711_p5 = scmp.lt.s32.totalorder %s110_s19, %s110_s19 }
  0x12   : > { %p885_p11 = pnand %p632_p9, %p1011_p1  ;;  %p704_p13 = scmp.ne.s32.totalorder %s110_s19, %s703_s24 }
  0x13   : > { %p712_p7 = scmp.lt.s32.totalorder %s703_s24, %s703_s24 }
  0x14   : > { %p694_p12 = pneg %p885_p11 }
  0x15   : > { %p713_p10 = por %p712_p7, %p711_p5 }
  0x16   : > { %p706_p0 = pnand %p704_p13, %p694_p12 }
  0x18   : > { %p707_p3 = pneg %p706_p0 }
  0x1a   : > { %p714_p2 = pnand %p713_p10, %p707_p3 }
  0x1c   : > { %717 = shalt.err (!%p714_p2)
}
  0x1d   : > { %s817_s25 = smov 256   ;;  %s818_s26 = smov 16  }
  0x1e   : > { %635 = dma.hbm_to_vmem [thread:$0]  (!%p885_p11), %s1008_s0, 16384, %s110_s19, [#allocation3], %s817_s25, %s817_s25, %s818_s26  }
  0x1f   : > { %p45_p9 = scmp.eq.s32.totalorder %s44_s23, 0  ;;  %p54_p12 = scmp.ne.s32.totalorder %s810_s11, %s806_s10 }
  0x20   : > { %p55_p10 = scmp.eq.s32.totalorder %s814_s12, 0  ;;  %p645_p2 = scmp.lt.s32.totalorder %s814_s12, 2 }
  0x21   : > { %s907_s29 = scalar_select %p45_p9, %s810_s11, %s47_s22  }
  0x22   : > { %p56_p13 = por %p55_p10, %p54_p12  ;;  %p1019_p0 = scmp.eq.s32.totalorder %s857_s13, 1 }
  0x23   : > { %s123_s3 = sand.u32 1, %s810_s11   ;;  %s622_s4 = sshll.u32 %s814_s12, 7 }
  0x24   : > { %p911_p3 = por %p1019_p0, %p54_p12  ;;  %s608_s5 = sshll.u32 %s123_s3, 3 }
  0x25   : > { %s920_s8 = scalar_lea.hbm %s1009_s1, %s622_s4  ;;  %s127_s14 = scalar_lea.vmem [#allocation5], %s608_s5 }
  0x26   : > { %s1020_s30 = scalar_select %p911_p3, 1, 0 }
  0x27   : > { %s135_s18 = sshll.u32 %s127_s14, 4  ;;  %p922_p11 = pnand %p645_p2, %p56_p13  ;;  %s136_s18 = int_to_ptr.vmem [resolvable:$true] %s135_s18 }
  0x28   : > { %s124_s20 = scalar_lea.sflag [#allocation6], %s123_s3  ;;  %s718_s22 = scalar_lea.hbm %s920_s8, 128 }
  0x29   : > { %p719_p5 = scmp.ne.s32.totalorder %s920_s8, %s718_s22  ;;  %p720_p7 = pneg %p922_p11 }
  0x2a   : > { %s723_s25 = scalar_lea.hbm %s1009_s1, 256  ;;  %p724_p10 = scmp.lt.s32.totalorder %s920_s8, %s1009_s1 }
  0x2b   : > { %p721_p9 = pnand %p720_p7, %p719_p5  ;;  %p725_p2 = scmp.lt.s32.totalorder %s723_s25, %s718_s22 }
  0x2d   : > { %p722_p12 = pneg %p721_p9  ;;  %p726_p13 = por %p725_p2, %p724_p10 }
  0x2f   : > { %p727_p0 = pnand %p726_p13, %p722_p12 }
  0x31   : > { %730 = shalt.err (!%p727_p0)
}
  0x32   : > { %s731_s28 = scalar_lea.vmem %s136_s18, 128  ;;  %s819_s3 = smov [#allocation5]  }
  0x33   : > { %p732_p1 = scmp.ne.s32.totalorder %s136_s18, %s731_s28  ;;  %s736_s4 = sshll.u32 %s819_s3, 4  ;;  %s737_s4 = int_to_ptr.vmem [resolvable:$false] %s736_s4 }
  0x34   : > { %s738_s5 = scalar_lea.vmem %s737_s4, 256  ;;  %p739_p5 = scmp.lt.s32.totalorder %s136_s18, %s737_s4 }
  0x35   : > { %p734_p6 = pnand %p732_p1, %p720_p7  ;;  %p740_p9 = scmp.lt.s32.totalorder %s738_s5, %s731_s28 }
  0x37   : > { %p735_p3 = pneg %p734_p6  ;;  %p741_p4 = por %p740_p9, %p739_p5 }
  0x39   : > { %p742_p8 = pnand %p741_p4, %p735_p3 }
  0x3b   : > { %745 = shalt.err (!%p742_p8)
}
  0x3c   : > { %639 = dma.hbm_to_vmem [thread:$0]  (!%p922_p11), %s920_s8, 128, %s136_s18, %s124_s20  }
  0x3d   : > { %p1022_p12 = scmp.ne.s32.totalorder %s1017_s17, 0 }
  0x3e   : > { %p1023_p10 = scmp.eq.s32.totalorder (!%p1022_p12), %s857_s13, 0 }
  0x3f   : > { %144 = sbr.rel (%p1022_p12) target bundleno = 388 (0x184), region = 28 }
  0x44   : > { %789 = dma.done.wait (%p1023_p10), [#allocation3], 16384   ;;  %p1024_p1 = pmov %p1023_p10 }
  0x45   : > { %s947_s6 = sand.u32 1, %s806_s10   ;;  %p1025_p4 = scmp.ne.s32.totalorder %s1015_s15, 0 }
  0x46   : > { %791 = vsyncadd (%p1024_p1), [#allocation3], 4294950912  ;;  %s613_s7 = sshll.u32 %s947_s6, 3  ;;  %s151_s14 = scalar_lea.sflag [#allocation6], %s947_s6 }
  0x47   : > { %s953_s8 = scalar_lea.vmem [#allocation5], %s613_s7 }
  0x48   : > { %793 = dma.done.wait (%p1025_p4), %s151_s14, 128  }
  0x49   : > { %795 = vsyncadd (%p1025_p4), %s151_s14, 4294967168  ;;  %v242_v0 = vld [vmem:[#allocation2 + $0xf8] sm:$0xff]  ;;  %v241_v2 = vld [vmem:[#allocation2 + $0xf0] sm:$0xff]  ;;  %vm179_vm0 = vcmask 1043456   ;;  %s623_s15 = sshll.u32 %s857_s13, 7  ;;  %s174_s17 = scalar_lea.vmem [#allocation7], %s613_s7 }
  0x4a   : > { %v306_v1 = vld [vmem:[#allocation2 + $0x2f8] sm:$0xff]  ;;  %339 = vmatprep.subr.mxu0 %v242_v0  ;;  %v305_v3 = vld [vmem:[#allocation2 + $0x2f0] sm:$0xff]  ;;  %v240_v4 = vld [vmem:[#allocation2 + $0xe8] sm:$0xff]  ;;  %s522_s18 = sshll.u32 %s174_s17, 4  ;;  %s520_s22 = scalar_lea.hbm %s1010_s2, %s623_s15  ;;  %s523_s18 = int_to_ptr.vmem [resolvable:$true] %s522_s18 }
  0x4b   : > { %410 = vmatprep.subr.mxu1 %v306_v1  ;;  %v304_v5 = vld [vmem:[#allocation2 + $0x2e8] sm:$0xff]  ;;  %340 = vmatpush1.msra.mxu0 %v241_v2  ;;  %v239_v6 = vld [vmem:[#allocation2 + $0xe0] sm:$0xff]  ;;  %v238_v8 = vld [vmem:[#allocation2 + $0xd8] sm:$0xff]  ;;  %s508_s23 = scalar_lea.sflag [#allocation4], %s947_s6  ;;  %s746_s24 = scalar_lea.vmem %s523_s18, 128 }
  0x4c   : > { %411 = vmatpush1.msra.mxu1 %v305_v3  ;;  %v303_v7 = vld [vmem:[#allocation2 + $0x2e0] sm:$0xff]  ;;  %341 = vmatprep.subr.mxu0 %v240_v4  ;;  %v302_v9 = vld [vmem:[#allocation2 + $0x2d8] sm:$0xff]  ;;  %v237_v10 = vld [vmem:[#allocation2 + $0xd0] sm:$0xff]  ;;  %p747_p6 = scmp.ne.s32.totalorder %s523_s18, %s746_s24  ;;  %p1026_p8 = scmp.ne.s32.totalorder %s1020_s30, 0 }
  0x4d   : > { %412 = vmatprep.subr.mxu1 %v304_v5  ;;  %v301_v11 = vld [vmem:[#allocation2 + $0x2d0] sm:$0xff]  ;;  %342 = vmatpush1.msra.mxu0 %v239_v6  ;;  %v236_v12 = vld [vmem:[#allocation2 + $0xc8] sm:$0xff]  ;;  %v235_v14 = vld [vmem:[#allocation2 + $0xc0] sm:$0xff]  ;;  %s820_s25 = smov [#allocation7]  }
  0x4e   : > { %413 = vmatpush1.msra.mxu1 %v303_v7  ;;  %v300_v13 = vld [vmem:[#allocation2 + $0x2c8] sm:$0xff]  ;;  %343 = vmatprep.subr.mxu0 %v238_v8  ;;  %v299_v15 = vld [vmem:[#allocation2 + $0x2c0] sm:$0xff]  ;;  %v234_v16 = vld [vmem:[#allocation2 + $0xb8] sm:$0xff]  ;;  %p748_p3 = pnand %p747_p6, %p1026_p8  ;;  %s750_s13 = sshll.u32 %s820_s25, 4  ;;  %s751_s13 = int_to_ptr.vmem [resolvable:$false] %s750_s13 }
  0x4f   : > { %414 = vmatprep.subr.mxu1 %v302_v9  ;;  %344 = vmatpush1.msra.mxu0 %v237_v10  ;;  %v298_v17 = vld [vmem:[#allocation2 + $0x2b8] sm:$0xff]  ;;  %v233_v18 = vld [vmem:[#allocation2 + $0xb0] sm:$0xff]  ;;  %v232_v20 = vld [vmem:[#allocation2 + $0xa8] sm:$0xff]  ;;  %s752_s26 = scalar_lea.vmem %s751_s13, 256  ;;  %p753_p7 = scmp.lt.s32.totalorder %s523_s18, %s751_s13 }
  0x50   : > { %415 = vmatpush1.msra.mxu1 %v301_v11  ;;  %345 = vmatprep.subr.mxu0 %v236_v12  ;;  %v297_v19 = vld [vmem:[#allocation2 + $0x2b0] sm:$0xff]  ;;  %v296_v21 = vld [vmem:[#allocation2 + $0x2a8] sm:$0xff]  ;;  %v231_v22 = vld [vmem:[#allocation2 + $0xa0] sm:$0xff]  ;;  %p749_p11 = pneg %p748_p3  ;;  %p754_p2 = scmp.lt.s32.totalorder %s752_s26, %s746_s24 }
  0x51   : > { %416 = vmatprep.subr.mxu1 %v300_v13  ;;  %346 = vmatpush1.msra.mxu0 %v235_v14  ;;  %v295_v23 = vld [vmem:[#allocation2 + $0x2a0] sm:$0xff]  ;;  %v230_v24 = vld [vmem:[#allocation2 + $0x98] sm:$0xff]  ;;  %v229_v26 = vld [vmem:[#allocation2 + $0x90] sm:$0xff] }
  0x52   : > { %417 = vmatpush1.msra.mxu1 %v299_v15  ;;  %347 = vmatprep.subr.mxu0 %v234_v16  ;;  %v294_v25 = vld [vmem:[#allocation2 + $0x298] sm:$0xff]  ;;  %v293_v27 = vld [vmem:[#allocation2 + $0x290] sm:$0xff]  ;;  %v228_v28 = vld [vmem:[#allocation2 + $0x88] sm:$0xff]  ;;  %p755_p13 = por %p754_p2, %p753_p7 }
  0x53   : > { %418 = vmatprep.subr.mxu1 %v298_v17  ;;  %348 = vmatpush1.msra.mxu0 %v233_v18  ;;  %v292_v29 = vld [vmem:[#allocation2 + $0x288] sm:$0xff]  ;;  %v227_v30 = vld [vmem:[#allocation2 + $0x80] sm:$0xff]  ;;  %v226_v32 = vld [vmem:[#allocation2 + $0x78] sm:$0xff] }
  0x54   : > { %419 = vmatpush1.msra.mxu1 %v297_v19  ;;  %349 = vmatprep.subr.mxu0 %v232_v20  ;;  %v291_v31 = vld [vmem:[#allocation2 + $0x280] sm:$0xff]  ;;  %v290_v33 = vld [vmem:[#allocation2 + $0x278] sm:$0xff]  ;;  %v225_v34 = vld [vmem:[#allocation2 + $0x70] sm:$0xff]  ;;  %p756_p0 = pnand %p755_p13, %p749_p11 }
  0x55   : > { %420 = vmatprep.subr.mxu1 %v296_v21  ;;  %350 = vmatpush1.msra.mxu0 %v231_v22  ;;  %v289_v35 = vld [vmem:[#allocation2 + $0x270] sm:$0xff]  ;;  %v224_v36 = vld [vmem:[#allocation2 + $0x68] sm:$0xff]  ;;  %v223_v38 = vld [vmem:[#allocation2 + $0x60] sm:$0xff] }
  0x56   : > { %421 = vmatpush1.msra.mxu1 %v295_v23  ;;  %351 = vmatprep.subr.mxu0 %v230_v24  ;;  %v288_v37 = vld [vmem:[#allocation2 + $0x268] sm:$0xff]  ;;  %v287_v39 = vld [vmem:[#allocation2 + $0x260] sm:$0xff]  ;;  %v222_v40 = vld [vmem:[#allocation2 + $0x58] sm:$0xff] }
  0x57   : > { %422 = vmatprep.subr.mxu1 %v294_v25  ;;  %352 = vmatpush1.msra.mxu0 %v229_v26  ;;  %v286_v41 = vld [vmem:[#allocation2 + $0x258] sm:$0xff]  ;;  %v221_v42 = vld [vmem:[#allocation2 + $0x50] sm:$0xff]  ;;  %v220_v44 = vld [vmem:[#allocation2 + $0x48] sm:$0xff] }
  0x58   : > { %423 = vmatpush1.msra.mxu1 %v293_v27  ;;  %353 = vmatprep.subr.mxu0 %v228_v28  ;;  %v285_v43 = vld [vmem:[#allocation2 + $0x250] sm:$0xff]  ;;  %v284_v45 = vld [vmem:[#allocation2 + $0x248] sm:$0xff]  ;;  %v219_v46 = vld [vmem:[#allocation2 + $0x40] sm:$0xff] }
  0x59   : > { %424 = vmatprep.subr.mxu1 %v292_v29  ;;  %354 = vmatpush1.msra.mxu0 %v227_v30  ;;  %v283_v47 = vld [vmem:[#allocation2 + $0x240] sm:$0xff]  ;;  %v218_v48 = vld [vmem:[#allocation2 + $0x38] sm:$0xff]  ;;  %v217_v50 = vld [vmem:[#allocation2 + $0x30] sm:$0xff] }
  0x5a   : > { %425 = vmatpush1.msra.mxu1 %v291_v31  ;;  %355 = vmatprep.subr.mxu0 %v226_v32  ;;  %v282_v49 = vld [vmem:[#allocation2 + $0x238] sm:$0xff]  ;;  %v281_v51 = vld [vmem:[#allocation2 + $0x230] sm:$0xff]  ;;  %v216_v52 = vld [vmem:[#allocation2 + $0x28] sm:$0xff] }
  0x5b   : > { %426 = vmatprep.subr.mxu1 %v290_v33  ;;  %356 = vmatpush1.msra.mxu0 %v225_v34  ;;  %v280_v53 = vld [vmem:[#allocation2 + $0x228] sm:$0xff]  ;;  %v215_v54 = vld [vmem:[#allocation2 + $0x20] sm:$0xff]  ;;  %v214_v56 = vld [vmem:[#allocation2 + $0x18] sm:$0xff] }
  0x5c   : > { %427 = vmatpush1.msra.mxu1 %v289_v35  ;;  %357 = vmatprep.subr.mxu0 %v224_v36  ;;  %v279_v55 = vld [vmem:[#allocation2 + $0x220] sm:$0xff]  ;;  %v278_v57 = vld [vmem:[#allocation2 + $0x218] sm:$0xff]  ;;  %v213_v58 = vld [vmem:[#allocation2 + $0x10] sm:$0xff] }
  0x5d   : > { %428 = vmatprep.subr.mxu1 %v288_v37  ;;  %358 = vmatpush1.msra.mxu0 %v223_v38  ;;  %v277_v59 = vld [vmem:[#allocation2 + $0x210] sm:$0xff]  ;;  %v212_v60 = vld [vmem:[#allocation2 + $0x8] sm:$0xff]  ;;  %v211_v62 = vld [vmem:[#allocation2] sm:$0xff] }
  0x5e   : > { %429 = vmatpush1.msra.mxu1 %v287_v39  ;;  %359 = vmatprep.subr.mxu0 %v222_v40  ;;  %v276_v61 = vld [vmem:[#allocation2 + $0x208] sm:$0xff]  ;;  %v275_v63 = vld [vmem:[#allocation2 + $0x200] sm:$0xff]  ;;  %v274_v0 = vld [vmem:[#allocation2 + $0x1f8] sm:$0xff] }
  0x5f   : > { %430 = vmatprep.subr.mxu1 %v286_v41  ;;  %360 = vmatpush1.msra.mxu0 %v221_v42  ;;  %v338_v1 = vld [vmem:[#allocation2 + $0x3f8] sm:$0xff]  ;;  %v273_v2 = vld [vmem:[#allocation2 + $0x1f0] sm:$0xff]  ;;  %v272_v4 = vld [vmem:[#allocation2 + $0x1e8] sm:$0xff] }
  0x60   : > { %431 = vmatpush1.msra.mxu1 %v285_v43  ;;  %361 = vmatprep.subr.mxu0 %v220_v44  ;;  %v337_v3 = vld [vmem:[#allocation2 + $0x3f0] sm:$0xff]  ;;  %v336_v5 = vld [vmem:[#allocation2 + $0x3e8] sm:$0xff]  ;;  %v271_v6 = vld [vmem:[#allocation2 + $0x1e0] sm:$0xff] }
  0x61   : > { %432 = vmatprep.subr.mxu1 %v284_v45  ;;  %362 = vmatpush1.msra.mxu0 %v219_v46  ;;  %v335_v7 = vld [vmem:[#allocation2 + $0x3e0] sm:$0xff]  ;;  %v270_v8 = vld [vmem:[#allocation2 + $0x1d8] sm:$0xff]  ;;  %v269_v10 = vld [vmem:[#allocation2 + $0x1d0] sm:$0xff] }
  0x62   : > { %433 = vmatpush1.msra.mxu1 %v283_v47  ;;  %363 = vmatprep.subr.mxu0 %v218_v48  ;;  %v334_v9 = vld [vmem:[#allocation2 + $0x3d8] sm:$0xff]  ;;  %v333_v11 = vld [vmem:[#allocation2 + $0x3d0] sm:$0xff]  ;;  %v268_v12 = vld [vmem:[#allocation2 + $0x1c8] sm:$0xff] }
  0x63   : > { %434 = vmatprep.subr.mxu1 %v282_v49  ;;  %364 = vmatpush1.msra.mxu0 %v217_v50  ;;  %v332_v13 = vld [vmem:[#allocation2 + $0x3c8] sm:$0xff]  ;;  %v267_v14 = vld [vmem:[#allocation2 + $0x1c0] sm:$0xff]  ;;  %v266_v16 = vld [vmem:[#allocation2 + $0x1b8] sm:$0xff] }
  0x64   : > { %435 = vmatpush1.msra.mxu1 %v281_v51  ;;  %365 = vmatprep.subr.mxu0 %v216_v52  ;;  %v331_v15 = vld [vmem:[#allocation2 + $0x3c0] sm:$0xff]  ;;  %v330_v17 = vld [vmem:[#allocation2 + $0x3b8] sm:$0xff]  ;;  %v265_v18 = vld [vmem:[#allocation2 + $0x1b0] sm:$0xff] }
  0x65   : > { %436 = vmatprep.subr.mxu1 %v280_v53  ;;  %366 = vmatpush1.msra.mxu0 %v215_v54  ;;  %v329_v19 = vld [vmem:[#allocation2 + $0x3b0] sm:$0xff]  ;;  %v264_v20 = vld [vmem:[#allocation2 + $0x1a8] sm:$0xff]  ;;  %v263_v22 = vld [vmem:[#allocation2 + $0x1a0] sm:$0xff] }
  0x66   : > { %437 = vmatpush1.msra.mxu1 %v279_v55  ;;  %367 = vmatprep.subr.mxu0 %v214_v56  ;;  %v328_v21 = vld [vmem:[#allocation2 + $0x3a8] sm:$0xff]  ;;  %v327_v23 = vld [vmem:[#allocation2 + $0x3a0] sm:$0xff]  ;;  %v262_v24 = vld [vmem:[#allocation2 + $0x198] sm:$0xff] }
  0x67   : > { %438 = vmatprep.subr.mxu1 %v278_v57  ;;  %368 = vmatpush1.msra.mxu0 %v213_v58  ;;  %v326_v25 = vld [vmem:[#allocation2 + $0x398] sm:$0xff]  ;;  %v960_v26 = vld [vmem:[%s953_s8] sm:$0xff]  ;;  %v261_v27 = vld [vmem:[#allocation2 + $0x190] sm:$0xff] }
  0x68   : > { %439 = vmatpush1.msra.mxu1 %v277_v59  ;;  %369 = vmatprep.subr.mxu0 %v212_v60  ;;  %v325_v28 = vld [vmem:[#allocation2 + $0x390] sm:$0xff]  ;;  %v177_v29 = vcombine.high %v960_v26, %v960_v26  ;;  %v180_v30 = vsel %vm179_vm0, %v960_v26, 0.0  ;;  %v197_v31 = vsel %vm179_vm0, %v960_v26, -inf  ;;  %v260_v32 = vld [vmem:[#allocation2 + $0x188] sm:$0xff]  ;;  %v259_v36 = vld [vmem:[#allocation2 + $0x180] sm:$0xff] }
  0x69   : > { %440 = vmatprep.subr.mxu1 %v276_v61  ;;  %370 = vmatpush1.msra.mxu0 %v211_v62  ;;  %v324_v33 = vld [vmem:[#allocation2 + $0x388] sm:$0xff]  ;;  %v181_v34 = vrot.slane %v180_v30, 4  ;;  %v198_v35 = vrot.slane %v197_v31, 4  ;;  %v323_v37 = vld [vmem:[#allocation2 + $0x380] sm:$0xff]  ;;  %v258_v40 = vld [vmem:[#allocation2 + $0x178] sm:$0xff] }
  0x6a   : > { %441 = vmatpush1.msra.mxu1 %v275_v63  ;;  %371 = vmatprep.subr.mxu0 %v274_v0  ;;  %v187_v38 = vsel %vm179_vm0, %v177_v29, 0.0  ;;  %v204_v39 = vsel %vm179_vm0, %v177_v29, -inf  ;;  %v322_v41 = vld [vmem:[#allocation2 + $0x378] sm:$0xff]  ;;  %v257_v46 = vld [vmem:[#allocation2 + $0x170] sm:$0xff]  ;;  %v256_v48 = vld [vmem:[#allocation2 + $0x168] sm:$0xff] }
  0x6b   : > { %442 = vmatprep.subr.mxu1 %v338_v1  ;;  %372 = vmatpush2.msra.mxu0 %v273_v2  ;;  %v188_v42 = vrot.slane %v187_v38, 4  ;;  %v205_v43 = vrot.slane %v204_v39, 4  ;;  %v182_v44 = vadd.f32 %v181_v34, %v180_v30  ;;  %v199_v45 = vmax.f32 %v197_v31, %v198_v35  ;;  %v321_v47 = vld [vmem:[#allocation2 + $0x370] sm:$0xff]  ;;  %v320_v49 = vld [vmem:[#allocation2 + $0x368] sm:$0xff]  ;;  %v255_v53 = vld [vmem:[#allocation2 + $0x160] sm:$0xff] }
  0x6c   : > { %443 = vmatpush2.msra.mxu1 %v337_v3  ;;  %373 = vmatprep.subr.mxu0 %v272_v4  ;;  %v319_v54 = vld [vmem:[#allocation2 + $0x360] sm:$0xff]  ;;  %v254_v55 = vld [vmem:[#allocation2 + $0x158] sm:$0xff]  ;;  %v253_v61 = vld [vmem:[#allocation2 + $0x150] sm:$0xff] }
  0x6d   : > { %444 = vmatprep.subr.mxu1 %v336_v5  ;;  %374 = vmatpush2.msra.mxu0 %v271_v6  ;;  %v189_v50 = vadd.f32 %v188_v42, %v187_v38  ;;  %v206_v51 = vmax.f32 %v204_v39, %v205_v43  ;;  %v183_v52 = vrot.slane %v182_v44, 2  ;;  %v318_v56 = vld [vmem:[#allocation2 + $0x358] sm:$0xff]  ;;  %v200_v60 = vrot.slane %v199_v45, 2  ;;  %v317_v62 = vld [vmem:[#allocation2 + $0x350] sm:$0xff]  ;;  %v252_v63 = vld [vmem:[#allocation2 + $0x148] sm:$0xff] }
  0x6e   : > { %445 = vmatpush2.msra.mxu1 %v335_v7  ;;  %375 = vmatprep.subr.mxu0 %v270_v8  ;;  %v316_v0 = vld [vmem:[#allocation2 + $0x348] sm:$0xff]  ;;  %v251_v2 = vld [vmem:[#allocation2 + $0x140] sm:$0xff]  ;;  %v250_v5 = vld [vmem:[#allocation2 + $0x138] sm:$0xff] }
  0x6f   : > { %446 = vmatprep.subr.mxu1 %v334_v9  ;;  %376 = vmatpush2.msra.mxu0 %v269_v10  ;;  %v190_v57 = vrot.slane %v189_v50, 2  ;;  %v207_v58 = vrot.slane %v206_v51, 2  ;;  %v184_v59 = vadd.f32 %v183_v52, %v182_v44  ;;  %v315_v3 = vld [vmem:[#allocation2 + $0x340] sm:$0xff]  ;;  %v314_v6 = vld [vmem:[#allocation2 + $0x338] sm:$0xff]  ;;  %v201_v9 = vmax.f32 %v199_v45, %v200_v60  ;;  %v249_v10 = vld [vmem:[#allocation2 + $0x130] sm:$0xff] }
  0x70   : > { %447 = vmatpush2.msra.mxu1 %v333_v11  ;;  %377 = vmatprep.subr.mxu0 %v268_v12  ;;  %v313_v11 = vld [vmem:[#allocation2 + $0x330] sm:$0xff]  ;;  %v248_v12 = vld [vmem:[#allocation2 + $0x128] sm:$0xff]  ;;  %v307_v30 = vld [vmem:[#allocation2 + $0x300] sm:$0xff]  ;;  %v493_v45 = vlaneseq }
  0x71   : > { %448 = vmatprep.subr.mxu1 %v332_v13  ;;  %378 = vmatpush2.msra.mxu0 %v267_v14  ;;  %v191_v1 = vadd.f32 %v190_v57, %v189_v50  ;;  %v208_v4 = vmax.f32 %v206_v51, %v207_v58  ;;  %v185_v8 = vrot.slane %v184_v59, 1  ;;  %v312_v13 = vld [vmem:[#allocation2 + $0x328] sm:$0xff] }
  0x72   : > { %449 = vmatpush2.msra.mxu1 %v331_v15  ;;  %379 = vmatprep.subr.mxu0 %v266_v16  ;;  %v247_v15 = vld [vmem:[#allocation2 + $0x120] sm:$0xff] }
  0x73   : > { %450 = vmatprep.subr.mxu1 %v330_v17  ;;  %380 = vmatpush2.msra.mxu0 %v265_v18  ;;  %v192_v7 = vrot.slane %v191_v1, 1  ;;  %v311_v16 = vld [vmem:[#allocation2 + $0x320] sm:$0xff]  ;;  %v209_v17 = vrot.slane %v208_v4, 1  ;;  %v246_v18 = vld [vmem:[#allocation2 + $0x118] sm:$0xff] }
  0x74   : > { %451 = vmatpush2.msra.mxu1 %v329_v19  ;;  %381 = vmatprep.subr.mxu0 %v264_v20  ;;  %v310_v19 = vld [vmem:[#allocation2 + $0x318] sm:$0xff]  ;;  %v186_v20 = vadd.f32 %v185_v8, %v184_v59 }
  0x75   : > { %452 = vmatprep.subr.mxu1 %v328_v21  ;;  %382 = vmatpush2.msra.mxu0 %v263_v22  ;;  %v193_v14 = vadd.f32 %v192_v7, %v191_v1  ;;  %v202_v21 = vrot.slane %v201_v9, 1  ;;  %v245_v22 = vld [vmem:[#allocation2 + $0x110] sm:$0xff]  ;;  %v210_v29 = vmax.f32 %v208_v4, %v209_v17 }
  0x76   : > { %453 = vmatpush2.msra.mxu1 %v327_v23  ;;  %383 = vmatprep.subr.mxu0 %v262_v24  ;;  %v309_v23 = vld [vmem:[#allocation2 + $0x310] sm:$0xff]  ;;  %v244_v24 = vld [vmem:[#allocation2 + $0x108] sm:$0xff]  ;;  %v195_v31 = vmul.f32 0.25, %v186_v20 }
  0x77   : > { %454 = vmatprep.subr.mxu1 %v326_v25  ;;  %384 = vmatpush2.msra.mxu0 %v261_v27  ;;  %v308_v25 = vld [vmem:[#allocation2 + $0x308] sm:$0xff]  ;;  %v196_v27 = vmul.f32 0.25, %v193_v14 }
  0x78   : > { %455 = vmatpush2.msra.mxu1 %v325_v28  ;;  %385 = vmatprep.subr.mxu0 %v260_v32  ;;  %v243_v28 = vld [vmem:[#allocation2 + $0x100] sm:$0xff]  ;;  %v203_v32 = vmax.f32 %v201_v9, %v202_v21 }
  0x79   : > { %456 = vmatprep.subr.mxu1 %v324_v33  ;;  %386 = vmatpush2.msra.mxu0 %v259_v36 }
  0x7a   : > { %457 = vmatpush2.msra.mxu1 %v323_v37  ;;  %387 = vmatprep.subr.mxu0 %v258_v40 }
  0x7b   : > { %458 = vmatprep.subr.mxu1 %v322_v41  ;;  %388 = vmatpush2.msra.mxu0 %v257_v46  ;;  %v494_v46 = vshrl.u32 %v493_v45, 7 }
  0x7c   : > { %459 = vmatpush2.msra.mxu1 %v321_v47  ;;  %389 = vmatprep.subr.mxu0 %v256_v48 }
  0x7d   : > { %460 = vmatprep.subr.mxu1 %v320_v49  ;;  %390 = vmatpush2.msra.mxu0 %v255_v53  ;;  %v495_v47 = vsub.s32 0, %v494_v46 }
  0x7e   : > { %461 = vmatpush2.msra.mxu1 %v319_v54  ;;  %391 = vmatprep.subr.mxu0 %v254_v55 }
  0x7f   : > { %462 = vmatprep.subr.mxu1 %v318_v56  ;;  %392 = vmatpush2.msra.mxu0 %v253_v61 }
  0x80   : > { %463 = vmatpush2.msra.mxu1 %v317_v62  ;;  %393 = vmatprep.subr.mxu0 %v252_v63 }
  0x81   : > { %464 = vmatprep.subr.mxu1 %v316_v0  ;;  %394 = vmatpush2.msra.mxu0 %v251_v2 }
  0x82   : > { %465 = vmatpush2.msra.mxu1 %v315_v3  ;;  %395 = vmatprep.subr.mxu0 %v250_v5 }
  0x83   : > { %466 = vmatprep.subr.mxu1 %v314_v6  ;;  %396 = vmatpush2.msra.mxu0 %v249_v10 }
  0x84   : > { %467 = vmatpush2.msra.mxu1 %v313_v11  ;;  %397 = vmatprep.subr.mxu0 %v248_v12 }
  0x85   : > { %468 = vmatprep.subr.mxu1 %v312_v13  ;;  %398 = vmatpush2.msra.mxu0 %v247_v15 }
  0x86   : > { %469 = vmatpush2.msra.mxu1 %v311_v16  ;;  %399 = vmatprep.subr.mxu0 %v246_v18 }
  0x87   : > { %470 = vmatprep.subr.mxu1 %v310_v19  ;;  %400 = vmatpush2.msra.mxu0 %v245_v22 }
  0x88   : > { %471 = vmatpush2.msra.mxu1 %v309_v23  ;;  %401 = vmatprep.subr.mxu0 %v244_v24 }
  0x89   : > { %472 = vmatprep.subr.mxu1 %v308_v25  ;;  %402 = vmatpush2.msra.mxu0 %v243_v28 }
  0x8a   : > { %403 = vmatprep.mubr.f32.mxu0 %v196_v27  ;;  %473 = vmatpush2.msra.mxu1 %v307_v30 }
  0x8b   : > { %474 = vmatprep.mubr.f32.mxu1 %v210_v29  ;;  %404 = vmatmul.mubr.f32.vlgmr.msra.gmra.mxu0 %v195_v31 }
  0x8c   : > { %475 = vmatmul.mubr.f32.vlgmr.msra.gmra.mxu1 %v203_v32 }
 0x14b   : > { %v405_v33 = vpop.f32.mrf.mxu0 }
 0x14c   : > { %v476_v34 = vpop.f32.mrf.mxu1 }
 0x14d   : > { %v477_v35 = vadd.f32 %v476_v34, %v405_v33  ;;  %v407_v36 = vpop.f32.mrf.mxu0 }
 0x14e   : > { %v478_v37 = vpop.f32.mrf.mxu1 }
 0x14f   : > { %v615_v38 = vmul.f32 -1.442695, %v477_v35  ;;  %v479_v39 = vadd.f32 %v478_v37, %v407_v36 }
 0x151   : > { %684 = vpow2.f32 %v615_v38  ;;  %v616_v40 = vmul.f32 -1.442695, %v479_v39 }
 0x153   : > { %686 = vpow2.f32 %v616_v40 }
 0x15e   : > { %v685_v41 = vpop.eup %684 }
 0x15f   : > { %v487_v42 = vadd.f32 1.0, %v685_v41 }
 0x160   : > { %v687_v43 = vpop.eup %686 }
 0x161   : > { %688 = vrcp.f32 %v487_v42  ;;  %v488_v44 = vadd.f32 1.0, %v687_v43 }
 0x163   : > { %690 = vrcp.f32 %v488_v44 }
 0x16e   : > { %v689_v48 = vpop.eup %688 }
 0x16f   : > { %v496_v50 = vrot.slane %v689_v48, %v495_v47 }
 0x170   : > { %v691_v49 = vpop.eup %690 }
 0x171   : > { %v500_v51 = vrot.slane %v691_v49, %v495_v47 }
 0x173   : > { %v503_v52 = vcombine.low %v496_v50, %v500_v51 }
 0x175   : > { %v505_v53 = vmul.f32 %v503_v52, %v960_v26 }
 0x177   : > { %506 = vst [vmem:[%s174_s17] sm:$0xff] %v505_v53 }
 0x178   : > { %759 = shalt.err (!%p756_p0)
}
 0x179   : > { %s760_s27 = scalar_lea.hbm %s520_s22, 128  ;;  %s764_s4 = scalar_lea.hbm %s1010_s2, 256 }
 0x17a   : > { %p761_p5 = scmp.ne.s32.totalorder %s520_s22, %s760_s27  ;;  %p765_p10 = scmp.lt.s32.totalorder %s520_s22, %s1010_s2 }
 0x17b   : > { %p766_p1 = scmp.lt.s32.totalorder %s764_s4, %s760_s27 }
 0x17c   : > { %p762_p9 = pnand %p761_p5, %p1026_p8 }
 0x17d   : > { %p767_p4 = por %p766_p1, %p765_p10 }
 0x17e   : > { %p763_p12 = pneg %p762_p9 }
 0x180   : > { %p768_p6 = pnand %p767_p4, %p763_p12 }
 0x182   : > { %771 = shalt.err (!%p768_p6)
}
 0x183   : > { %630 = dma.vmem_to_hbm [thread:$0]  (%p1026_p8), %s523_s18, 128, %s520_s22, %s508_s23  }
 0x184 PF: > { %s534_s7 = sand.u32 1, %s802_s9   ;;  %p1027_p3 = scmp.ne.s32.totalorder %s1016_s16, 0 }
 0x185   : > { %p1028_p11 = scmp.ge.s32.totalorder %s814_s12, 2  ;;  %s535_s14 = scalar_lea.sflag [#allocation4], %s534_s7 }
 0x187   : > { %p641_p7 = pnand %p1028_p11, %p1027_p3 }
 0x189   : > { %p642_p2 = pneg %p641_p7 }
 0x18b   : > { %797 = dma.done.wait (%p642_p2), %s535_s14, 128  }
 0x18c   : > { %799 = vsyncadd (%p642_p2), %s535_s14, 4294967168  ;;  %p16_p13 = scmp.ge.s32.totalorder %s890_s21, 4   ;;  %s1029_s9 = smov %s806_s10 }
 0x18d   : > { %s1030_s10 = smov %s810_s11  ;;  %s1031_s11 = smov %s907_s29 }
 0x18e   : > { %s1032_s12 = smov %s890_s21  ;;  %18 = sbr.rel (!%p16_p13) target bundleno = 6 (0x6), region = 78 }
 0x193   :  { %540 = vsyncpa [#allocation3], 1 }
 0x194   :  { %542 = vsyncpa [#allocation3 + $0x1], 1 }
 0x195   :  { %543 = vsyncpa [#allocation6], 1 }
 0x196   :  { %545 = vsyncpa [#allocation6 + $0x1], 1 }
 0x197   :  { %546 = vsyncpa [#allocation4], 1 }
 0x198   :  { %548 = vsyncpa [#allocation4 + $0x1], 1 }

</bundles_post_ra>
